<compile_context>
chip_gen: v7x
topology: tpu7x:2x2x1
jax: 0.10.0
libtpu: 0.0.40
codegen_flags: <defaults>
</compile_context>

<pallas_src>
import functools

import jax
import jax.numpy as jnp
from jax.experimental import pallas as pl
from jax.experimental.pallas import tpu as pltpu


def _round_up(x: int, m: int) -> int:
    return ((x + m - 1) // m) * m


def _cdiv(a: int, b: int) -> int:
    return -(-a // b)


# --------------------------------------------------------------------------- #
# Kernel                                                                      #
# --------------------------------------------------------------------------- #
def _mlp_tanh_kernel(*refs, n_layers: int):
    """refs = (x_ref, w0, b0, w1, b1, ..., w_{L-1}, b_{L-1}, out_ref)."""
    x_ref = refs[0]
    out_ref = refs[-1]
    param_refs = refs[1:-1]
    assert len(param_refs) == 2 * n_layers

    h = x_ref[...]
    if h.dtype != jnp.float32:
        h = h.astype(jnp.float32)

    for i in range(n_layers):
        w = param_refs[2 * i][...]
        b = param_refs[2 * i + 1][...]          # biases are kept in f32
        # bf16 weights -> feed bf16 LHS to the MXU; accumulation stays f32 via
        # preferred_element_type.  f32 weights -> no casts at all.
        lhs = h.astype(jnp.bfloat16) if w.dtype == jnp.bfloat16 else h
        h = jnp.dot(lhs, w, preferred_element_type=jnp.float32) + b
        if i < n_layers - 1:
            h = jnp.maximum(h, 0.0)             # ReLU (VPU, f32)

    out_ref[...] = jnp.tanh(h).astype(out_ref.dtype)


# --------------------------------------------------------------------------- #
# Parameter padding                                                           #
# --------------------------------------------------------------------------- #
def pad_params_for_tpu(weights, biases, lane: int = 128):
    """Zero-pad every HIDDEN layer's output features to a multiple of `lane`
    (and the next layer's input rows to match).  The LAST layer is left
    unpadded so the kernel's HBM writeback stays narrow (= action_dim columns).
    Padded weight rows and bias columns are exactly zero, so padded activations
    stay 0 through ReLU and numerics are unchanged."""
    padded_w, padded_b = [], []
    prev_out_pad = 0
    last = len(weights) - 1
    for i, (w, b) in enumerate(zip(weights, biases)):
        _, out_dim = w.shape
        out_pad = 0 if i == last else _round_up(out_dim, lane) - out_dim
        padded_w.append(jnp.pad(w, ((0, prev_out_pad), (0, out_pad))))
        padded_b.append(jnp.pad(b, ((0, 0), (0, out_pad))))
        prev_out_pad = out_pad
    return padded_w, padded_b


# --------------------------------------------------------------------------- #
# Launch helpers                                                              #
# --------------------------------------------------------------------------- #
_PARAM_SINGLE_BUFFER_OK = None   # resolved lazily on the first pallas_call


def _param_spec(shape, single_buffer: bool):
    """Constant-index BlockSpec for a weight/bias (VMEM-resident across tiles).
    When supported, request a single VMEM buffer: the block index never
    changes, so the default double buffer would only waste VMEM."""
    if single_buffer:
        return pl.BlockSpec(shape, lambda i: (0, 0), pipeline_mode=pl.Buffered(1))
    return pl.BlockSpec(shape, lambda i: (0, 0))


def _vmem_limit_bytes() -> int:
    """Generation-aware scoped-VMEM limit: ~75% of physical, clamped to [32,100] MiB
    (=> ~48 MiB on v7x's 64 MiB VMEM, ~96 MiB on v5e/v6e's 128 MiB)."""
    phys = 64 * 1024 * 1024          # conservative default = v7x physical VMEM
    try:
        phys = int(pltpu.get_tpu_info().vmem_capacity_bytes)
    except Exception:
        pass
    return max(32 * 1024 * 1024, min(phys * 3 // 4, 100 * 1024 * 1024))


def _choose_batch_tiling(B: int, widest_feature: int, block_batch=None):
    """Pick (tb, n_steps, b_padded).

    Derived from B so the whole call is only a handful of grid steps (the
    ~0.35us fixed cost per step dominates at these layer sizes), kept at an
    even count >= 2 so ("parallel",) semantics can split tiles across v7x's two
    TensorCores, and capped so ~3 live f32 activation slabs of the widest layer
    stay far below the scoped VMEM limit on every generation."""
    if block_batch is not None:                      # explicit override (tests)
        tb = _round_up(max(8, block_batch), 8)
        n_steps = max(1, _cdiv(B, tb))
    else:
        tile_cap = min(4096, max(256, ((12 << 20) // (12 * max(widest_feature, 1))) // 8 * 8))
        n_steps = max(2, _cdiv(B, tile_cap))
        if n_steps % 2:
            n_steps += 1                             # even split for v7x megacore
        tb = _round_up(_cdiv(B, n_steps), 8)
    return tb, n_steps, n_steps * tb


# --------------------------------------------------------------------------- #
# Public forward                                                              #
# --------------------------------------------------------------------------- #
def actor_ppo_forward(state, weights, biases, action_dim, *, block_batch=None):
    """Pallas forward pass: tanh(MLP(state)).

    state:      (B, state_dim) f32
    weights:    list of (in_i, out_i) arrays (f32 or bf16), hidden dims padded
                via pad_params_for_tpu (last layer unpadded)
    biases:     list of (1, out_i) f32 arrays (padded columns exactly zero)
    action_dim: true output dimension
    returns:    (B, action_dim) f32
    """
    global _PARAM_SINGLE_BUFFER_OK

    n_layers = len(weights)
    B, state_dim = state.shape
    out_w = int(weights[-1].shape[1])

    widest = max([state_dim] + [int(w.shape[1]) for w in weights])
    tb, n_steps, b_padded = _choose_batch_tiling(B, widest, block_batch)

    # B-derived tiles keep the batch pad to < 8*n_steps rows; skip it when exact.
    state_p = state if b_padded == B else jnp.pad(state, ((0, b_padded - B), (0, 0)))

    flops = 2 * b_padded * sum(int(w.shape[0]) * int(w.shape[1]) for w in weights)
    bytes_accessed = (
        sum(w.size * w.dtype.itemsize for w in weights)
        + sum(b.size * b.dtype.itemsize for b in biases)
        + state_p.size * state_p.dtype.itemsize
        + b_padded * out_w * 4
    )
    cost = pl.CostEstimate(flops=flops,
                           transcendentals=b_padded * out_w,   # tanh
                           bytes_accessed=bytes_accessed)

    kernel = functools.partial(_mlp_tanh_kernel, n_layers=n_layers)
    vmem_limit = _vmem_limit_bytes()

    def _launch(single_buffer_params: bool):
        # State / output stream over the batch; params use a constant index_map
        # so they are fetched once and stay resident across all batch tiles.
        in_specs = [pl.BlockSpec((tb, state_dim), lambda i: (i, 0))]
        operands = [state_p]
        for w, b in zip(weights, biases):
            in_specs.append(_param_spec(w.shape, single_buffer_params))
            in_specs.append(_param_spec(b.shape, single_buffer_params))
            operands.extend((w, b))
        # Narrow, unpadded output block: last dim == full array dim, so the
        # (8,128) rule is satisfied and HBM writeback is only action_dim wide.
        out_spec = pl.BlockSpec((tb, out_w), lambda i: (i, 0))
        return pl.pallas_call(
            kernel,
            out_shape=jax.ShapeDtypeStruct((b_padded, out_w), jnp.float32),
            grid=(n_steps,),
            in_specs=in_specs,
            out_specs=out_spec,
            compiler_params=pltpu.CompilerParams(
                dimension_semantics=("parallel",),   # batch tiles are independent
                vmem_limit_bytes=vmem_limit,
            ),
            cost_estimate=cost,
        )(*operands)

    # Prefer single-buffered resident params; fall back (and remember) if this
    # JAX build does not accept pl.Buffered(1) on a grid BlockSpec.
    attempts = ([True, False] if _PARAM_SINGLE_BUFFER_OK is None
                else [_PARAM_SINGLE_BUFFER_OK])
    out, err = None, None
    for single in attempts:
        try:
            out = _launch(single)
            _PARAM_SINGLE_BUFFER_OK = single
            err = None
            break
        except Exception as e:                       # noqa: BLE001
            err = e
    if err is not None:
        raise err

    if b_padded != B:
        out = out[:B]
    if out_w != action_dim:                          # only if a padded last layer was passed
        out = out[:, :action_dim]
    return out


# --------------------------------------------------------------------------- #
# Init + reference                                                            #
# --------------------------------------------------------------------------- #
def init_actor_ppo_params(key, dims, state_dim, action_dim, param_dtype=jnp.float32):
    """Deterministic init for the MLP [state_dim, *dims, action_dim]."""
    layer_dims = [state_dim, *dims, action_dim]
    weights, biases = [], []
    for i in range(len(layer_dims) - 1):
        fan_in, fan_out = layer_dims[i], layer_dims[i + 1]
        key, wk, bk = jax.random.split(key, 3)
        bound = 1.0 / jnp.sqrt(fan_in)
        w = jax.random.uniform(wk, (fan_in, fan_out), jnp.float32, -bound, bound)
        b = jax.random.uniform(bk, (1, fan_out), jnp.float32, -bound, bound)
        weights.append(w.astype(param_dtype))
        biases.append(b)                             # biases stay f32 (tiny)
    # action_std_log exists on the module but is unused by forward().
    action_std_log = jnp.zeros((1, action_dim), jnp.float32)
    return weights, biases, action_std_log


def reference_forward(state, weights, biases):
    h = state
    for i, (w, b) in enumerate(zip(weights, biases)):
        h = h @ w.astype(jnp.float32) + b
        if i < len(weights) - 1:
            h = jnp.maximum(h, 0.0)
    return jnp.tanh(h)


if __name__ == "__main__":
    # Shapes consistent with the module: state_dim=16, hidden [32, 32], action_dim=4.
    state_dim, action_dim = 16, 4
    hidden_dims = [32, 32]

    key = jax.random.PRNGKey(0)
    key, sk1, sk2 = jax.random.split(key, 3)

    weights, biases, _ = init_actor_ppo_params(key, hidden_dims, state_dim, action_dim)
    pw, pb = pad_params_for_tpu(weights, biases)

    # --- Test 1: tiny batch (B=2), B-derived tiling (2 grid steps) ------------
    state_small = jax.random.normal(sk1, (2, state_dim), jnp.float32)
    out_small = jax.block_until_ready(
        actor_ppo_forward(state_small, pw, pb, action_dim))
    ref_small = reference_forward(state_small, weights, biases)
    assert out_small.shape == (2, action_dim)
    assert jnp.allclose(out_small, ref_small, atol=1e-5, rtol=1e-5), \
        "f32 small-batch mismatch vs reference"

    # --- Test 2: multi-tile batch (B=64, TB=16 -> 4 pipelined grid steps) -----
    state_big = jax.random.normal(sk2, (64, state_dim), jnp.float32)
    out_big = jax.block_until_ready(
        actor_ppo_forward(state_big, pw, pb, action_dim, block_batch=16))
    ref_big = reference_forward(state_big, weights, biases)
    assert out_big.shape == (64, action_dim)
    assert jnp.allclose(out_big, ref_big, atol=1e-5, rtol=1e-5), \
        "f32 batched mismatch vs reference"

    # --- Test 3: bf16 weights (MXU-native), f32 accumulation ------------------
    pw_bf16 = [w.astype(jnp.bfloat16) for w in pw]
    w_bf16_ref = [w.astype(jnp.bfloat16) for w in weights]
    out_bf16 = jax.block_until_ready(
        actor_ppo_forward(state_big, pw_bf16, pb, action_dim, block_batch=16))
    ref_bf16 = reference_forward(state_big, w_bf16_ref, biases)
    assert out_bf16.shape == (64, action_dim)
    assert jnp.allclose(out_bf16, ref_bf16, atol=5e-2, rtol=5e-2), \
        "bf16-weight mismatch vs reference"

    print("KERNEL_OK")
</pallas_src>

<mosaic_0001>
module attributes {stable_mosaic.version = 11 : i64} {
  func.func @_mlp_tanh_kernel(%arg0: i32, %arg1: memref<8x16xf32, #tpu.memory_space<vmem>>, %arg2: memref<16x128xf32, #tpu.memory_space<vmem>>, %arg3: memref<1x128xf32, #tpu.memory_space<vmem>>, %arg4: memref<128x128xf32, #tpu.memory_space<vmem>>, %arg5: memref<1x128xf32, #tpu.memory_space<vmem>>, %arg6: memref<128x4xf32, #tpu.memory_space<vmem>>, %arg7: memref<1x4xf32, #tpu.memory_space<vmem>>, %arg8: memref<8x4xf32, #tpu.memory_space<vmem>>) attributes {dimension_semantics = [#tpu.dimension_semantics<parallel>], iteration_bounds = array<i64: 2>, scalar_prefetch = 0 : i64, scratch_operands = 0 : i64, tpu.core_type = #tpu.core_type<tc>, window_params = [{transform_indices = @transform_0, window_bounds = array<i64: 8, 16>}, {pipeline_mode = #tpu.pipeline_mode<synchronous>, transform_indices = @transform_1, window_bounds = array<i64: 16, 128>}, {pipeline_mode = #tpu.pipeline_mode<synchronous>, transform_indices = @transform_2, window_bounds = array<i64: 1, 128>}, {pipeline_mode = #tpu.pipeline_mode<synchronous>, transform_indices = @transform_3, window_bounds = array<i64: 128, 128>}, {pipeline_mode = #tpu.pipeline_mode<synchronous>, transform_indices = @transform_4, window_bounds = array<i64: 1, 128>}, {pipeline_mode = #tpu.pipeline_mode<synchronous>, transform_indices = @transform_5, window_bounds = array<i64: 128, 4>}, {pipeline_mode = #tpu.pipeline_mode<synchronous>, transform_indices = @transform_6, window_bounds = array<i64: 1, 4>}, {transform_indices = @transform_7, window_bounds = array<i64: 8, 4>}]} {
    %c0 = arith.constant 0 : index
    %c0_0 = arith.constant 0 : index
    %0 = vector.load %arg1[%c0, %c0_0] : memref<8x16xf32, #tpu.memory_space<vmem>>, vector<8x16xf32>
    %c0_1 = arith.constant 0 : index
    %c0_2 = arith.constant 0 : index
    %1 = vector.load %arg2[%c0_1, %c0_2] : memref<16x128xf32, #tpu.memory_space<vmem>>, vector<16x128xf32>
    %c0_3 = arith.constant 0 : index
    %c0_4 = arith.constant 0 : index
    %2 = vector.load %arg3[%c0_3, %c0_4] : memref<1x128xf32, #tpu.memory_space<vmem>>, vector<1x128xf32>
    %cst = arith.constant dense<0.000000e+00> : vector<8x128xf32>
    %3 = tpu.matmul %0, %1, %cst {dimension_numbers = #tpu.dot_dimension_numbers<[1], [0], [0], [1], [0, 0, 1, 1], [], []>} : vector<8x16xf32>, vector<16x128xf32>, vector<8x128xf32> -> vector<8x128xf32>
    %4 = vector.broadcast %2 : vector<1x128xf32> to vector<8x128xf32>
    %5 = arith.addf %3, %4 : vector<8x128xf32>
    %cst_5 = arith.constant 0.000000e+00 : f32
    %6 = vector.broadcast %cst_5 : f32 to vector<8x128xf32>
    %7 = arith.maximumf %5, %6 : vector<8x128xf32>
    %c0_6 = arith.constant 0 : index
    %c0_7 = arith.constant 0 : index
    %8 = vector.load %arg4[%c0_6, %c0_7] : memref<128x128xf32, #tpu.memory_space<vmem>>, vector<128x128xf32>
    %c0_8 = arith.constant 0 : index
    %c0_9 = arith.constant 0 : index
    %9 = vector.load %arg5[%c0_8, %c0_9] : memref<1x128xf32, #tpu.memory_space<vmem>>, vector<1x128xf32>
    %cst_10 = arith.constant dense<0.000000e+00> : vector<8x128xf32>
    %10 = tpu.matmul %7, %8, %cst_10 {dimension_numbers = #tpu.dot_dimension_numbers<[1], [0], [0], [1], [0, 0, 1, 1], [], []>} : vector<8x128xf32>, vector<128x128xf32>, vector<8x128xf32> -> vector<8x128xf32>
    %11 = vector.broadcast %9 : vector<1x128xf32> to vector<8x128xf32>
    %12 = arith.addf %10, %11 : vector<8x128xf32>
    %cst_11 = arith.constant 0.000000e+00 : f32
    %13 = vector.broadcast %cst_11 : f32 to vector<8x128xf32>
    %14 = arith.maximumf %12, %13 : vector<8x128xf32>
    %c0_12 = arith.constant 0 : index
    %c0_13 = arith.constant 0 : index
    %15 = vector.load %arg6[%c0_12, %c0_13] : memref<128x4xf32, #tpu.memory_space<vmem>>, vector<128x4xf32>
    %c0_14 = arith.constant 0 : index
    %c0_15 = arith.constant 0 : index
    %16 = vector.load %arg7[%c0_14, %c0_15] : memref<1x4xf32, #tpu.memory_space<vmem>>, vector<1x4xf32>
    %cst_16 = arith.constant dense<0.000000e+00> : vector<8x4xf32>
    %17 = tpu.matmul %14, %15, %cst_16 {dimension_numbers = #tpu.dot_dimension_numbers<[1], [0], [0], [1], [0, 0, 1, 1], [], []>} : vector<8x128xf32>, vector<128x4xf32>, vector<8x4xf32> -> vector<8x4xf32>
    %18 = vector.broadcast %16 : vector<1x4xf32> to vector<8x4xf32>
    %19 = arith.addf %17, %18 : vector<8x4xf32>
    %20 = math.tanh %19 : vector<8x4xf32>
    %c0_17 = arith.constant 0 : index
    %c0_18 = arith.constant 0 : index
    %21 = vector.load %arg8[%c0_17, %c0_18] : memref<8x4xf32, #tpu.memory_space<vmem>>, vector<8x4xf32>
    tpu.vector_store %arg8[%c0_17, %c0_18], %20 {strides = array<i32>} : memref<8x4xf32, #tpu.memory_space<vmem>>, vector<8x4xf32>,
    return
  }
  func.func @transform_0(%arg0: i32) -> (i32, i32) {
    %c0_i32 = arith.constant 0 : i32
    %c0_i32_0 = arith.constant 0 : i32
    return %arg0, %c0_i32 : i32, i32
  }
  func.func @transform_1(%arg0: i32) -> (i32, i32) {
    %c0_i32 = arith.constant 0 : i32
    %c0_i32_0 = arith.constant 0 : i32
    %c0_i32_1 = arith.constant 0 : i32
    return %c0_i32, %c0_i32_0 : i32, i32
  }
  func.func @transform_2(%arg0: i32) -> (i32, i32) {
    %c0_i32 = arith.constant 0 : i32
    %c0_i32_0 = arith.constant 0 : i32
    %c0_i32_1 = arith.constant 0 : i32
    return %c0_i32, %c0_i32_0 : i32, i32
  }
  func.func @transform_3(%arg0: i32) -> (i32, i32) {
    %c0_i32 = arith.constant 0 : i32
    %c0_i32_0 = arith.constant 0 : i32
    %c0_i32_1 = arith.constant 0 : i32
    return %c0_i32, %c0_i32_0 : i32, i32
  }
  func.func @transform_4(%arg0: i32) -> (i32, i32) {
    %c0_i32 = arith.constant 0 : i32
    %c0_i32_0 = arith.constant 0 : i32
    %c0_i32_1 = arith.constant 0 : i32
    return %c0_i32, %c0_i32_0 : i32, i32
  }
  func.func @transform_5(%arg0: i32) -> (i32, i32) {
    %c0_i32 = arith.constant 0 : i32
    %c0_i32_0 = arith.constant 0 : i32
    %c0_i32_1 = arith.constant 0 : i32
    return %c0_i32, %c0_i32_0 : i32, i32
  }
  func.func @transform_6(%arg0: i32) -> (i32, i32) {
    %c0_i32 = arith.constant 0 : i32
    %c0_i32_0 = arith.constant 0 : i32
    %c0_i32_1 = arith.constant 0 : i32
    return %c0_i32, %c0_i32_0 : i32, i32
  }
  func.func @transform_7(%arg0: i32) -> (i32, i32) {
    %c0_i32 = arith.constant 0 : i32
    %c0_i32_0 = arith.constant 0 : i32
    return %arg0, %c0_i32 : i32, i32
  }
}

module attributes {stable_mosaic.version = 11 : i64} {
  func.func @_mlp_tanh_kernel(%arg0: i32, %arg1: memref<8x16xf32, #tpu.memory_space<vmem>>, %arg2: memref<16x128xf32, #tpu.memory_space<vmem>>, %arg3: memref<1x128xf32, #tpu.memory_space<vmem>>, %arg4: memref<128x128xf32, #tpu.memory_space<vmem>>, %arg5: memref<1x128xf32, #tpu.memory_space<vmem>>, %arg6: memref<128x4xf32, #tpu.memory_space<vmem>>, %arg7: memref<1x4xf32, #tpu.memory_space<vmem>>, %arg8: memref<8x4xf32, #tpu.memory_space<vmem>>) attributes {dimension_semantics = [#tpu.dimension_semantics<parallel>], iteration_bounds = array<i64: 2>, scalar_prefetch = 0 : i64, scratch_operands = 0 : i64, tpu.core_type = #tpu.core_type<tc>, window_params = [{transform_indices = @transform_0, window_bounds = array<i64: 8, 16>}, {pipeline_mode = #tpu.pipeline_mode<synchronous>, transform_indices = @transform_1, window_bounds = array<i64: 16, 128>}, {pipeline_mode = #tpu.pipeline_mode<synchronous>, transform_indices = @transform_2, window_bounds = array<i64: 1, 128>}, {pipeline_mode = #tpu.pipeline_mode<synchronous>, transform_indices = @transform_3, window_bounds = array<i64: 128, 128>}, {pipeline_mode = #tpu.pipeline_mode<synchronous>, transform_indices = @transform_4, window_bounds = array<i64: 1, 128>}, {pipeline_mode = #tpu.pipeline_mode<synchronous>, transform_indices = @transform_5, window_bounds = array<i64: 128, 4>}, {pipeline_mode = #tpu.pipeline_mode<synchronous>, transform_indices = @transform_6, window_bounds = array<i64: 1, 4>}, {transform_indices = @transform_7, window_bounds = array<i64: 8, 4>}]} {
    %c0 = arith.constant 0 : index
    %c0_0 = arith.constant 0 : index
    %0 = vector.load %arg1[%c0, %c0_0] : memref<8x16xf32, #tpu.memory_space<vmem>>, vector<8x16xf32>
    %c0_1 = arith.constant 0 : index
    %c0_2 = arith.constant 0 : index
    %1 = vector.load %arg2[%c0_1, %c0_2] : memref<16x128xf32, #tpu.memory_space<vmem>>, vector<16x128xf32>
    %c0_3 = arith.constant 0 : index
    %c0_4 = arith.constant 0 : index
    %2 = vector.load %arg3[%c0_3, %c0_4] : memref<1x128xf32, #tpu.memory_space<vmem>>, vector<1x128xf32>
    %cst = arith.constant dense<0.000000e+00> : vector<8x128xf32>
    %3 = tpu.matmul %0, %1, %cst {dimension_numbers = #tpu.dot_dimension_numbers<[1], [0], [0], [1], [0, 0, 1, 1], [], []>} : vector<8x16xf32>, vector<16x128xf32>, vector<8x128xf32> -> vector<8x128xf32>
    %4 = vector.broadcast %2 : vector<1x128xf32> to vector<8x128xf32>
    %5 = arith.addf %3, %4 : vector<8x128xf32>
    %cst_5 = arith.constant 0.000000e+00 : f32
    %6 = vector.broadcast %cst_5 : f32 to vector<8x128xf32>
    %7 = arith.maximumf %5, %6 : vector<8x128xf32>
    %c0_6 = arith.constant 0 : index
    %c0_7 = arith.constant 0 : index
    %8 = vector.load %arg4[%c0_6, %c0_7] : memref<128x128xf32, #tpu.memory_space<vmem>>, vector<128x128xf32>
    %c0_8 = arith.constant 0 : index
    %c0_9 = arith.constant 0 : index
    %9 = vector.load %arg5[%c0_8, %c0_9] : memref<1x128xf32, #tpu.memory_space<vmem>>, vector<1x128xf32>
    %cst_10 = arith.constant dense<0.000000e+00> : vector<8x128xf32>
    %10 = tpu.matmul %7, %8, %cst_10 {dimension_numbers = #tpu.dot_dimension_numbers<[1], [0], [0], [1], [0, 0, 1, 1], [], []>} : vector<8x128xf32>, vector<128x128xf32>, vector<8x128xf32> -> vector<8x128xf32>
    %11 = vector.broadcast %9 : vector<1x128xf32> to vector<8x128xf32>
    %12 = arith.addf %10, %11 : vector<8x128xf32>
    %cst_11 = arith.constant 0.000000e+00 : f32
    %13 = vector.broadcast %cst_11 : f32 to vector<8x128xf32>
    %14 = arith.maximumf %12, %13 : vector<8x128xf32>
    %c0_12 = arith.constant 0 : index
    %c0_13 = arith.constant 0 : index
    %15 = vector.load %arg6[%c0_12, %c0_13] : memref<128x4xf32, #tpu.memory_space<vmem>>, vector<128x4xf32>
    %c0_14 = arith.constant 0 : index
    %c0_15 = arith.constant 0 : index
    %16 = vector.load %arg7[%c0_14, %c0_15] : memref<1x4xf32, #tpu.memory_space<vmem>>, vector<1x4xf32>
    %cst_16 = arith.constant dense<0.000000e+00> : vector<8x4xf32>
    %17 = tpu.matmul %14, %15, %cst_16 {dimension_numbers = #tpu.dot_dimension_numbers<[1], [0], [0], [1], [0, 0, 1, 1], [], []>} : vector<8x128xf32>, vector<128x4xf32>, vector<8x4xf32> -> vector<8x4xf32>
    %18 = vector.broadcast %16 : vector<1x4xf32> to vector<8x4xf32>
    %19 = arith.addf %17, %18 : vector<8x4xf32>
    %20 = math.tanh %19 : vector<8x4xf32>
    %c0_17 = arith.constant 0 : index
    %c0_18 = arith.constant 0 : index
    %21 = vector.load %arg8[%c0_17, %c0_18] : memref<8x4xf32, #tpu.memory_space<vmem>>, vector<8x4xf32>
    tpu.vector_store %arg8[%c0_17, %c0_18], %20 {strides = array<i32>} : memref<8x4xf32, #tpu.memory_space<vmem>>, vector<8x4xf32>,
    return
  }
  func.func @transform_0(%arg0: i32) -> (i32, i32) {
    %c0_i32 = arith.constant 0 : i32
    %c0_i32_0 = arith.constant 0 : i32
    return %arg0, %c0_i32 : i32, i32
  }
  func.func @transform_1(%arg0: i32) -> (i32, i32) {
    %c0_i32 = arith.constant 0 : i32
    %c0_i32_0 = arith.constant 0 : i32
    %c0_i32_1 = arith.constant 0 : i32
    return %c0_i32, %c0_i32_0 : i32, i32
  }
  func.func @transform_2(%arg0: i32) -> (i32, i32) {
    %c0_i32 = arith.constant 0 : i32
    %c0_i32_0 = arith.constant 0 : i32
    %c0_i32_1 = arith.constant 0 : i32
    return %c0_i32, %c0_i32_0 : i32, i32
  }
  func.func @transform_3(%arg0: i32) -> (i32, i32) {
    %c0_i32 = arith.constant 0 : i32
    %c0_i32_0 = arith.constant 0 : i32
    %c0_i32_1 = arith.constant 0 : i32
    return %c0_i32, %c0_i32_0 : i32, i32
  }
  func.func @transform_4(%arg0: i32) -> (i32, i32) {
    %c0_i32 = arith.constant 0 : i32
    %c0_i32_0 = arith.constant 0 : i32
    %c0_i32_1 = arith.constant 0 : i32
    return %c0_i32, %c0_i32_0 : i32, i32
  }
  func.func @transform_5(%arg0: i32) -> (i32, i32) {
    %c0_i32 = arith.constant 0 : i32
    %c0_i32_0 = arith.constant 0 : i32
    %c0_i32_1 = arith.constant 0 : i32
    return %c0_i32, %c0_i32_0 : i32, i32
  }
  func.func @transform_6(%arg0: i32) -> (i32, i32) {
    %c0_i32 = arith.constant 0 : i32
    %c0_i32_0 = arith.constant 0 : i32
    %c0_i32_1 = arith.constant 0 : i32
    return %c0_i32, %c0_i32_0 : i32, i32
  }
  func.func @transform_7(%arg0: i32) -> (i32, i32) {
    %c0_i32 = arith.constant 0 : i32
    %c0_i32_0 = arith.constant 0 : i32
    return %arg0, %c0_i32 : i32, i32
  }
}

</mosaic_0001>

<bundles_post_ra>
// kernel: tpu_custom_call.1
= control target key start
LH: loop header
LB: loop body
LE: loop exit
PB: predicated region body
PF: predicated region fallthrough
CT: control target
= control target key end

     0   :  { %12 = vsyncpa [#allocation3], 0  ;;  %s1306_s0 = inlined_call_operand.hbm [shape: f32[16,16], index: 0, kind: input, shape index: {}]   ;;  %s1307_s1 = inlined_call_operand.hbm [shape: f32[16,128], index: 1, kind: input, shape index: {}]   ;;  %s1308_s2 = inlined_call_operand.vmem [shape: f32[1,128], index: 2, kind: input, shape index: {}]   ;;  %s1309_s3 = inlined_call_operand.vmem [shape: f32[128,128], index: 3, kind: input, shape index: {}]   ;;  %s1310_s4 = inlined_call_operand.vmem [shape: f32[1,128], index: 4, kind: input, shape index: {}]   ;;  %s1311_s5 = inlined_call_operand.vmem [shape: f32[128,4], index: 5, kind: input, shape index: {}]   ;;  %s1312_s6 = inlined_call_operand.vmem [shape: f32[1,4], index: 6, kind: input, shape index: {}]   ;;  %s1313_s7 = inlined_call_operand.vmem [shape: f32[16,4], index: 7, kind: output, shape index: {}]  }
   0x1   :  { %14 = vsyncpa [#allocation3 + $0x1], 0 }
   0x2   :  { %15 = vsyncpa [#allocation5], 0  ;;  %s1042_s24 = smov 0   ;;  %s1044_s25 = smov 0  }
   0x3   :  { %s1046_s26 = smov 0   ;;  %s1048_s27 = smov 0  }
   0x4 LB: > { %s1061_s28 = sadd.s32 4294967295, %s993_s27   ;;  %p41_p0 = scmp.ne.s32.totalorder %s985_s25, %s981_s24  ;;  %s993_s27 = sphi %s1048_s27, %s1328_s27   ;;  %s989_s26 = sphi %s1046_s26, %s1327_s26   ;;  %s985_s25 = sphi %s1044_s25, %s1326_s25   ;;  %s981_s24 = sphi %s1042_s24, %s1325_s24  }
   0x5   : > { %p1314_p1 = scmp.eq.s32.totalorder %s1061_s28, 0  ;;  %p660_p2 = scmp.ge.s32.totalorder %s993_s27, 1 }
   0x6   : > { %p204_p3 = scmp.lt.s32.totalorder %s993_s27, 3  ;;  %s995_s8 = smov [#allocation4]  }
   0x7   : > { %p1069_p4 = por %p1314_p1, %p41_p0  ;;  %s216_s9 = sshll.u32 %s995_s8, 4  ;;  %s217_s9 = int_to_ptr.vmem [resolvable:$true] %s216_s9 }
   0x8   : > { %p1073_p5 = pnand %p660_p2, %p204_p3  ;;  %s1086_s11 = sadd.s32 1, %s993_s27  }
   0x9   : > { %s1317_s29 = scalar_select %p1069_p4, 1, 0 }
   0xa   : > { %s1318_s30 = scalar_select %p1073_p5, 1, 0 }
   0xb   : > { %p846_p6 = pneg %p1073_p5  ;;  %s28_s12 = sadd.s32 1, %s989_s26 }
   0xc   : > { %s25_s13 = ssub.s32 %s993_s27, %s1086_s11  ;;  %s897_s16 = scalar_lea.hbm %s1307_s1, 256 }
   0xd   : > { %p1081_p7 = pnand %p846_p6, %p1314_p1  ;;  %p898_p8 = scmp.ne.s32.totalorder %s1307_s1, %s897_s16 }
   0xe   : > { %p904_p12 = scmp.lt.u32.totalorder %s897_s16, %s1307_s1 }
   0xf   : > { %p899_p9 = pneg %p1081_p7 }
  0x11   : > { %p900_p10 = pnand %p899_p9, %p898_p8 }
  0x13   : > { %p901_p11 = pneg %p900_p10 }
  0x15   : > { %p906_p13 = pnand %p904_p12, %p901_p11 }
  0x17   : > { %909 = shalt.err (!%p906_p13)
}
  0x18   : > { %s910_s21 = scalar_lea.vmem %s217_s9, 256  ;;  %p918_p6 = scmp.lt.s32.totalorder %s217_s9, %s217_s9 }
  0x19   : > { %p911_p0 = scmp.ne.s32.totalorder %s217_s9, %s910_s21  ;;  %p919_p1 = scmp.lt.s32.totalorder %s910_s21, %s910_s21 }
  0x1b   : > { %p913_p2 = pnand %p911_p0, %p899_p9  ;;  %p920_p4 = por %p919_p1, %p918_p6 }
  0x1d   : > { %p914_p3 = pneg %p913_p2 }
  0x1f   : > { %p921_p5 = pnand %p920_p4, %p914_p3 }
  0x21   : > { %924 = shalt.err (!%p921_p5)
}
  0x22   : > { %s996_s22 = smov 128   ;;  %s997_s23 = smov 8  }
  0x23   : > { %849 = dma.hbm_to_vmem [thread:$0]  (!%p1081_p7), %s1307_s1, 256, %s217_s9, [#allocation5], %s996_s22, %s996_s22, %s997_s23  }
  0x24   : > { %p26_p8 = scmp.eq.s32.totalorder %s25_s13, 0  ;;  %p35_p9 = scmp.ne.s32.totalorder %s989_s26, %s985_s25 }
  0x25   : > { %p36_p1 = scmp.eq.s32.totalorder %s993_s27, 0  ;;  %p855_p4 = scmp.lt.s32.totalorder %s993_s27, 2 }
  0x26   : > { %s1112_s14 = scalar_select %p26_p8, %s989_s26, %s28_s12  }
  0x27   : > { %p37_p5 = por %p36_p1, %p35_p9  ;;  %s245_s15 = sand.u32 1, %s989_s26  }
  0x28   : > { %s663_s16 = sshll.u32 %s245_s15, 3  ;;  %s664_s17 = sshll.u32 %s993_s27, 7 }
  0x29   : > { %s1119_s20 = scalar_lea.hbm %s1306_s0, %s664_s17  ;;  %s249_s9 = scalar_lea.vmem [#allocation2], %s663_s16 }
  0x2a   : > { %s256_s10 = sshll.u32 %s249_s9, 4  ;;  %p1123_p7 = pnand %p855_p4, %p37_p5  ;;  %s1121_s10 = int_to_ptr.vmem [resolvable:$true] %s256_s10 }
  0x2b   : > { %s246_s27 = scalar_lea.sflag [#allocation3], %s245_s15  ;;  %s925_s13 = scalar_lea.hbm %s1119_s20, 128 }
  0x2c   : > { %p926_p10 = scmp.ne.s32.totalorder %s1119_s20, %s925_s13  ;;  %p927_p11 = pneg %p1123_p7 }
  0x2d   : > { %s930_s23 = scalar_lea.hbm %s1306_s0, 256  ;;  %p931_p0 = scmp.lt.u32.totalorder %s1119_s20, %s1306_s0 }
  0x2e   : > { %p928_p12 = pnand %p927_p11, %p926_p10  ;;  %p932_p2 = scmp.lt.u32.totalorder %s930_s23, %s925_s13 }
  0x2f   : > { %p934_p6 = scmp.lt.u32.totalorder %s925_s13, %s1119_s20 }
  0x30   : > { %p929_p13 = pneg %p928_p12  ;;  %p933_p3 = por %p932_p2, %p931_p0 }
  0x32   : > { %p935_p8 = por %p934_p6, %p933_p3 }
  0x34   : > { %p936_p9 = pnand %p935_p8, %p929_p13 }
  0x36   : > { %939 = shalt.err (!%p936_p9)
}
  0x37   : > { %s940_s15 = scalar_lea.vmem %s1121_s10, 128  ;;  %s998_s16 = smov [#allocation2]  }
  0x38   : > { %p941_p1 = scmp.ne.s32.totalorder %s1121_s10, %s940_s15  ;;  %s945_s17 = sshll.u32 %s998_s16, 4  ;;  %s946_s17 = int_to_ptr.vmem [resolvable:$false] %s945_s17 }
  0x39   : > { %s947_s18 = scalar_lea.vmem %s946_s17, 256  ;;  %p948_p10 = scmp.lt.s32.totalorder %s1121_s10, %s946_s17 }
  0x3a   : > { %p943_p4 = pnand %p941_p1, %p927_p11  ;;  %p949_p12 = scmp.lt.s32.totalorder %s947_s18, %s940_s15 }
  0x3c   : > { %p944_p5 = pneg %p943_p4  ;;  %p950_p0 = por %p949_p12, %p948_p10 }
  0x3e   : > { %p951_p2 = pnand %p950_p0, %p944_p5 }
  0x40   : > { %954 = shalt.err (!%p951_p2)
}
  0x41   : > { %853 = dma.hbm_to_vmem [thread:$0]  (!%p1123_p7), %s1119_s20, 128, %s1121_s10, %s246_s27  }
  0x42   : > { %p1321_p13 = scmp.ne.s32.totalorder %s1318_s30, 0 }
  0x43   : > { %s267_s19 = sand.u32 (!%p1321_p13), 1, %s985_s25   ;;  %p1322_p11 = scmp.ne.s32.totalorder (!%p1321_p13), %s1317_s29, 0 }
  0x44   : > { %265 = sbr.rel (%p1321_p13) target bundleno = 743 (0x2e7), region = 48  ;;  %s666_s9 = sshll.u32 (!%p1321_p13), %s267_s19, 3 }
  0x45   : > { %s268_s13 = scalar_lea.sflag (!%p1321_p13), [#allocation3], %s267_s19  ;;  %s271_s21 = scalar_lea.vmem (!%p1321_p13), [#allocation2], %s666_s9 }
  0x4b   : > { %972 = dma.done.wait (%p1322_p11), %s268_s13, 128  }
  0x4c   : > { %974 = vsyncadd (%p1322_p11), %s268_s13, 4294967168  ;;  %p1323_p3 = scmp.eq.s32.totalorder %s1061_s28, 0 }
  0x4e   : > { %976 = dma.done.wait (%p1323_p3), [#allocation5], 256   ;;  %p1324_p6 = pmov %p1323_p3 }
  0x4f   : > { %v999_v0 = vmov 0.0|0.0   ;;  %vm1000_vm0 = vmmov 0   ;;  %v1001_v1 = vmov 0.0   ;;  %v310_v2 = vld [vmem:[#allocation4] sm:$0xff]  ;;  %v311_v3 = vld [vmem:[#allocation4 + $0x8] sm:$0xff]  ;;  %v394_v5 = vld [vmem:[%s1309_s3] sm:$0xff] }
  0x50   : > { %978 = vsyncadd (%p1324_p6), [#allocation5], 4294967040  ;;  %789 = vmatprep.subr.bf16.mxu0 %v999_v0  ;;  %716 = vmatprep.mubr.msk.f32.mxu0 %vm1000_vm0, %v1001_v1  ;;  %v790_v4 = vpack.c.bf16 %v311_v3, %v310_v2  ;;  %v395_v6 = vld [vmem:[%s1309_s3 + $0x8] sm:$0xff]  ;;  %v396_v7 = vld [vmem:[%s1309_s3 + $0x10] sm:$0xff]  ;;  %vm319_vm1 = vcmask 130048   ;;  %p305_p7 = scmp.lt.s32.totalorder %s1061_s28, 1 }
  0x51   : > { %792 = vmatprep.subr.bf16.mxu1 %v999_v0  ;;  %751 = vmatprep.mubr.msk.f32.mxu1 %vm1000_vm0, %v1001_v1  ;;  %v793_v8 = vpack.c.bf16 %v395_v6, %v394_v5  ;;  %v397_v9 = vld [vmem:[%s1309_s3 + $0x18] sm:$0xff]  ;;  %v309_v10 = vld [vmem:[%s271_s21] sm:$0xff]  ;;  %v400_v15 = vld [vmem:[%s1309_s3 + $0x30] sm:$0xff]  ;;  %vm582_vm2 = vcmask 31744  }
  0x52   : > { %791 = vmatpush3.bf16.msra.mxu0 %v790_v4  ;;  %v796_v11 = vpack.c.bf16 %v397_v9, %v396_v7  ;;  %v398_v12 = vld [vmem:[%s1309_s3 + $0x20] sm:$0xff]  ;;  %v399_v13 = vld [vmem:[%s1309_s3 + $0x28] sm:$0xff]  ;;  %v401_v16 = vld [vmem:[%s1309_s3 + $0x38] sm:$0xff]  ;;  %s1330_s28 = smov (!%p305_p7, %s1061_s28), 1 }
  0x53   : > { %794 = vmatpush3.bf16.msra.mxu1 %v793_v8  ;;  %816 = vmatprep.subr.bf16.mxu0 %v999_v0  ;;  %v799_v14 = vpack.c.bf16 %v399_v13, %v398_v12  ;;  %v802_v17 = vpack.c.bf16 %v401_v16, %v400_v15  ;;  %v402_v18 = vld [vmem:[%s1309_s3 + $0x40] sm:$0xff]  ;;  %v403_v19 = vld [vmem:[%s1309_s3 + $0x48] sm:$0xff]  ;;  %v404_v21 = vld [vmem:[%s1309_s3 + $0x50] sm:$0xff]  ;;  %s668_s13 = sshll.u32 %s1330_s28, 3 }
  0x54   : > { %795 = vmatprep.subr.bf16.mxu1 %v999_v0  ;;  %v805_v20 = vpack.c.bf16 %v403_v19, %v402_v18  ;;  %v405_v22 = vld [vmem:[%s1309_s3 + $0x58] sm:$0xff]  ;;  %v406_v24 = vld [vmem:[%s1309_s3 + $0x60] sm:$0xff]  ;;  %v407_v25 = vld [vmem:[%s1309_s3 + $0x68] sm:$0xff]  ;;  %s308_s30 = scalar_lea.vmem %s1313_s7, %s668_s13 }
  0x55   : > { %717 = vmatmul.mubr.msk.f32.vlgmr.msra.gmra.mrb[0].mxu0 %vm319_vm1, %v309_v10  ;;  %v808_v23 = vpack.c.bf16 %v405_v22, %v404_v21  ;;  %v811_v26 = vpack.c.bf16 %v407_v25, %v406_v24  ;;  %v408_v27 = vld [vmem:[%s1309_s3 + $0x70] sm:$0xff]  ;;  %v409_v28 = vld [vmem:[%s1309_s3 + $0x78] sm:$0xff]  ;;  %v488_v30 = vld [vmem:[%s1311_s5] sm:$0xff] }
  0x56   : > { %786 = vmatprep.mubr.msk.f32.mxu0 %vm1000_vm0, %v1001_v1  ;;  %v814_v29 = vpack.c.bf16 %v409_v28, %v408_v27  ;;  %v489_v31 = vld [vmem:[%s1311_s5 + $0x8] sm:$0xff]  ;;  %v490_v32 = vld [vmem:[%s1311_s5 + $0x10] sm:$0xff]  ;;  %v491_v34 = vld [vmem:[%s1311_s5 + $0x18] sm:$0xff] }
  0x57   : > { %797 = vmatpush3.bf16.msra.mxu1 %v796_v11  ;;  %v817_v33 = vpack.c.bf16 %v489_v31, %v488_v30  ;;  %v820_v35 = vpack.c.bf16 %v491_v34, %v490_v32  ;;  %v492_v36 = vld [vmem:[%s1311_s5 + $0x20] sm:$0xff]  ;;  %v493_v37 = vld [vmem:[%s1311_s5 + $0x28] sm:$0xff]  ;;  %v494_v39 = vld [vmem:[%s1311_s5 + $0x30] sm:$0xff] }
  0x58   : > { %798 = vmatprep.subr.bf16.mxu1 %v999_v0  ;;  %v823_v38 = vpack.c.bf16 %v493_v37, %v492_v36  ;;  %v495_v40 = vld [vmem:[%s1311_s5 + $0x38] sm:$0xff]  ;;  %v496_v42 = vld [vmem:[%s1311_s5 + $0x40] sm:$0xff]  ;;  %v497_v43 = vld [vmem:[%s1311_s5 + $0x48] sm:$0xff] }
  0x59   : > { %818 = vmatpush3.bf16.msra.mxu0 %v817_v33  ;;  %v826_v41 = vpack.c.bf16 %v495_v40, %v494_v39  ;;  %v829_v44 = vpack.c.bf16 %v497_v43, %v496_v42  ;;  %v498_v45 = vld [vmem:[%s1311_s5 + $0x50] sm:$0xff]  ;;  %v499_v46 = vld [vmem:[%s1311_s5 + $0x58] sm:$0xff]  ;;  %v500_v48 = vld [vmem:[%s1311_s5 + $0x60] sm:$0xff] }
  0x5a   : > { %819 = vmatprep.subr.bf16.mxu0 %v999_v0  ;;  %v832_v47 = vpack.c.bf16 %v499_v46, %v498_v45  ;;  %v501_v49 = vld [vmem:[%s1311_s5 + $0x68] sm:$0xff]  ;;  %v669_v51 = vld [vmem:[%s1308_s2] ss:$0 sm:$0xff]  ;;  %v502_v56 = vld [vmem:[%s1311_s5 + $0x70] sm:$0xff] }
  0x5b   : > { %800 = vmatpush3.bf16.msra.mxu1 %v799_v14  ;;  %v835_v50 = vpack.c.bf16 %v501_v49, %v500_v48  ;;  %v503_v57 = vld [vmem:[%s1311_s5 + $0x78] sm:$0xff]  ;;  %v671_v59 = vld [vmem:[%s1310_s4] ss:$0 sm:$0xff] }
  0x5c   : > { %801 = vmatprep.subr.bf16.mxu1 %v999_v0  ;;  %v838_v58 = vpack.c.bf16 %v503_v57, %v502_v56 }
  0x5d   : > { %821 = vmatpush3.bf16.msra.mxu0 %v820_v35 }
  0x5e   : > { %822 = vmatprep.subr.bf16.mxu0 %v999_v0 }
  0x5f   : > { %803 = vmatpush3.bf16.msra.mxu1 %v802_v17 }
  0x60   : > { %804 = vmatprep.subr.bf16.mxu1 %v999_v0 }
  0x61   : > { %824 = vmatpush3.bf16.msra.mxu0 %v823_v38 }
  0x62   : > { %825 = vmatprep.subr.bf16.mxu0 %v999_v0 }
  0x63   : > { %806 = vmatpush3.bf16.msra.mxu1 %v805_v20 }
  0x64   : > { %807 = vmatprep.subr.bf16.mxu1 %v999_v0 }
  0x65   : > { %827 = vmatpush3.bf16.msra.mxu0 %v826_v41 }
  0x66   : > { %828 = vmatprep.subr.bf16.mxu0 %v999_v0 }
  0x67   : > { %809 = vmatpush3.bf16.msra.mxu1 %v808_v23 }
  0x68   : > { %810 = vmatprep.subr.bf16.mxu1 %v999_v0 }
  0x69   : > { %830 = vmatpush3.bf16.msra.mxu0 %v829_v44 }
  0x6a   : > { %831 = vmatprep.subr.bf16.mxu0 %v999_v0 }
  0x6b   : > { %812 = vmatpush3.bf16.msra.mxu1 %v811_v26 }
  0x6c   : > { %813 = vmatprep.subr.bf16.mxu1 %v999_v0 }
  0x6d   : > { %833 = vmatpush3.bf16.msra.mxu0 %v832_v47 }
  0x6e   : > { %834 = vmatprep.subr.bf16.mxu0 %v999_v0 }
  0x6f   : > { %815 = vmatpush3.bf16.msra.mxu1 %v814_v29 }
  0x71   : > { %836 = vmatpush3.bf16.msra.mxu0 %v835_v50 }
  0x72   : > { %837 = vmatprep.subr.bf16.mxu0 %v999_v0  ;;  %v672_v0 = vld [vmem:[%s1312_s6] ss:$0 sm:$0xff] }
  0x75   : > { %839 = vmatpush3.bf16.msra.mxu0 %v838_v58 }
 0x128   : > { %v389_v52 = vpop.f32.mrb[0].mxu0 }
 0x129   : > { %v390_v53 = vadd.f32 %v669_v51, %v389_v52  ;;  %v718_v54 = vpop.f32.mrb[1].mxu0 }
 0x12b   : > { %v393_v55 = vmax.f32 %v390_v53, 0.0 }
 0x12d   : > { %752 = vmatmul.mubr.f32.vlgmr.msra.gmra.mrb[0].mxu1 %v393_v55 }
 0x200   : > { %v483_v60 = vpop.f32.mrb[0].mxu1 }
 0x201   : > { %v484_v61 = vadd.f32 %v671_v59, %v483_v60  ;;  %v753_v62 = vpop.f32.mrb[1].mxu1 }
 0x203   : > { %v487_v63 = vmax.f32 %v484_v61, 0.0 }
 0x205   : > { %787 = vmatmul.mubr.f32.vlgmr.msra.gmra.mrb[2].mxu0 %v487_v63 }
 0x2d8   : > { %v577_v1 = vpop.f32.mrb[2].mxu0 }
 0x2d9   : > { %v578_v2 = vadd.f32 %v672_v0, %v577_v1  ;;  %v788_v3 = vpop.f32.mrb[3].mxu0 }
 0x2db   : > { %895 = vtanh.f32 %v578_v2 }
 0x2e5   : > { %v896_v4 = vpop.eup %895 }
 0x2e6   : > { %583 = vst.msk [vmem:[%s308_s30] sm:$0xff] %vm582_vm2, %v896_v4 }
 0x2e7 PF: > { %p18_p8 = scmp.ge.s32.totalorder %s1086_s11, 4   ;;  %s1325_s24 = smov %s985_s25 }
 0x2e8   : > { %s1326_s25 = smov %s989_s26  ;;  %s1327_s26 = smov %s1112_s14 }
 0x2e9   : > { %s1328_s27 = smov %s1086_s11  ;;  %20 = sbr.rel (!%p18_p8) target bundleno = 4 (0x4), region = 92 }
 0x2f0   :  { %603 = vsyncpa [#allocation3], 1 }
 0x2f1   :  { %605 = vsyncpa [#allocation3 + $0x1], 1 }
 0x2f2   :  { %606 = vsyncpa [#allocation5], 1 }

// kernel: tpu_custom_call.1
= control target key start
LH: loop header
LB: loop body
LE: loop exit
PB: predicated region body
PF: predicated region fallthrough
CT: control target
= control target key end

     0   :  { %12 = vsyncpa [#allocation3], 0  ;;  %s1306_s0 = inlined_call_operand.hbm [shape: f32[16,16], index: 0, kind: input, shape index: {}]   ;;  %s1307_s1 = inlined_call_operand.hbm [shape: f32[16,128], index: 1, kind: input, shape index: {}]   ;;  %s1308_s2 = inlined_call_operand.vmem [shape: f32[1,128], index: 2, kind: input, shape index: {}]   ;;  %s1309_s3 = inlined_call_operand.vmem [shape: f32[128,128], index: 3, kind: input, shape index: {}]   ;;  %s1310_s4 = inlined_call_operand.vmem [shape: f32[1,128], index: 4, kind: input, shape index: {}]   ;;  %s1311_s5 = inlined_call_operand.vmem [shape: f32[128,4], index: 5, kind: input, shape index: {}]   ;;  %s1312_s6 = inlined_call_operand.vmem [shape: f32[1,4], index: 6, kind: input, shape index: {}]   ;;  %s1313_s7 = inlined_call_operand.vmem [shape: f32[16,4], index: 7, kind: output, shape index: {}]  }
   0x1   :  { %14 = vsyncpa [#allocation3 + $0x1], 0 }
   0x2   :  { %15 = vsyncpa [#allocation5], 0  ;;  %s1042_s24 = smov 0   ;;  %s1044_s25 = smov 0  }
   0x3   :  { %s1046_s26 = smov 0   ;;  %s1048_s27 = smov 0  }
   0x4 LB: > { %s1061_s28 = sadd.s32 4294967295, %s993_s27   ;;  %p41_p0 = scmp.ne.s32.totalorder %s985_s25, %s981_s24  ;;  %s993_s27 = sphi %s1048_s27, %s1328_s27   ;;  %s989_s26 = sphi %s1046_s26, %s1327_s26   ;;  %s985_s25 = sphi %s1044_s25, %s1326_s25   ;;  %s981_s24 = sphi %s1042_s24, %s1325_s24  }
   0x5   : > { %p1314_p1 = scmp.eq.s32.totalorder %s1061_s28, 0  ;;  %p660_p2 = scmp.ge.s32.totalorder %s993_s27, 1 }
   0x6   : > { %p204_p3 = scmp.lt.s32.totalorder %s993_s27, 3  ;;  %s995_s8 = smov [#allocation4]  }
   0x7   : > { %p1069_p4 = por %p1314_p1, %p41_p0  ;;  %s216_s9 = sshll.u32 %s995_s8, 4  ;;  %s217_s9 = int_to_ptr.vmem [resolvable:$true] %s216_s9 }
   0x8   : > { %p1073_p5 = pnand %p660_p2, %p204_p3  ;;  %s1086_s11 = sadd.s32 1, %s993_s27  }
   0x9   : > { %s1317_s29 = scalar_select %p1069_p4, 1, 0 }
   0xa   : > { %s1318_s30 = scalar_select %p1073_p5, 1, 0 }
   0xb   : > { %p846_p6 = pneg %p1073_p5  ;;  %s28_s12 = sadd.s32 1, %s989_s26 }
   0xc   : > { %s25_s13 = ssub.s32 %s993_s27, %s1086_s11  ;;  %s897_s16 = scalar_lea.hbm %s1307_s1, 256 }
   0xd   : > { %p1081_p7 = pnand %p846_p6, %p1314_p1  ;;  %p898_p8 = scmp.ne.s32.totalorder %s1307_s1, %s897_s16 }
   0xe   : > { %p904_p12 = scmp.lt.u32.totalorder %s897_s16, %s1307_s1 }
   0xf   : > { %p899_p9 = pneg %p1081_p7 }
  0x11   : > { %p900_p10 = pnand %p899_p9, %p898_p8 }
  0x13   : > { %p901_p11 = pneg %p900_p10 }
  0x15   : > { %p906_p13 = pnand %p904_p12, %p901_p11 }
  0x17   : > { %909 = shalt.err (!%p906_p13)
}
  0x18   : > { %s910_s21 = scalar_lea.vmem %s217_s9, 256  ;;  %p918_p6 = scmp.lt.s32.totalorder %s217_s9, %s217_s9 }
  0x19   : > { %p911_p0 = scmp.ne.s32.totalorder %s217_s9, %s910_s21  ;;  %p919_p1 = scmp.lt.s32.totalorder %s910_s21, %s910_s21 }
  0x1b   : > { %p913_p2 = pnand %p911_p0, %p899_p9  ;;  %p920_p4 = por %p919_p1, %p918_p6 }
  0x1d   : > { %p914_p3 = pneg %p913_p2 }
  0x1f   : > { %p921_p5 = pnand %p920_p4, %p914_p3 }
  0x21   : > { %924 = shalt.err (!%p921_p5)
}
  0x22   : > { %s996_s22 = smov 128   ;;  %s997_s23 = smov 8  }
  0x23   : > { %849 = dma.hbm_to_vmem [thread:$0]  (!%p1081_p7), %s1307_s1, 256, %s217_s9, [#allocation5], %s996_s22, %s996_s22, %s997_s23  }
  0x24   : > { %p26_p8 = scmp.eq.s32.totalorder %s25_s13, 0  ;;  %p35_p9 = scmp.ne.s32.totalorder %s989_s26, %s985_s25 }
  0x25   : > { %p36_p1 = scmp.eq.s32.totalorder %s993_s27, 0  ;;  %p855_p4 = scmp.lt.s32.totalorder %s993_s27, 2 }
  0x26   : > { %s1112_s14 = scalar_select %p26_p8, %s989_s26, %s28_s12  }
  0x27   : > { %p37_p5 = por %p36_p1, %p35_p9  ;;  %s245_s15 = sand.u32 1, %s989_s26  }
  0x28   : > { %s663_s16 = sshll.u32 %s245_s15, 3  ;;  %s664_s17 = sshll.u32 %s993_s27, 7 }
  0x29   : > { %s1119_s20 = scalar_lea.hbm %s1306_s0, %s664_s17  ;;  %s249_s9 = scalar_lea.vmem [#allocation2], %s663_s16 }
  0x2a   : > { %s256_s10 = sshll.u32 %s249_s9, 4  ;;  %p1123_p7 = pnand %p855_p4, %p37_p5  ;;  %s1121_s10 = int_to_ptr.vmem [resolvable:$true] %s256_s10 }
  0x2b   : > { %s246_s27 = scalar_lea.sflag [#allocation3], %s245_s15  ;;  %s925_s13 = scalar_lea.hbm %s1119_s20, 128 }
  0x2c   : > { %p926_p10 = scmp.ne.s32.totalorder %s1119_s20, %s925_s13  ;;  %p927_p11 = pneg %p1123_p7 }
  0x2d   : > { %s930_s23 = scalar_lea.hbm %s1306_s0, 256  ;;  %p931_p0 = scmp.lt.u32.totalorder %s1119_s20, %s1306_s0 }
  0x2e   : > { %p928_p12 = pnand %p927_p11, %p926_p10  ;;  %p932_p2 = scmp.lt.u32.totalorder %s930_s23, %s925_s13 }
  0x2f   : > { %p934_p6 = scmp.lt.u32.totalorder %s925_s13, %s1119_s20 }
  0x30   : > { %p929_p13 = pneg %p928_p12  ;;  %p933_p3 = por %p932_p2, %p931_p0 }
  0x32   : > { %p935_p8 = por %p934_p6, %p933_p3 }
  0x34   : > { %p936_p9 = pnand %p935_p8, %p929_p13 }
  0x36   : > { %939 = shalt.err (!%p936_p9)
}
  0x37   : > { %s940_s15 = scalar_lea.vmem %s1121_s10, 128  ;;  %s998_s16 = smov [#allocation2]  }
  0x38   : > { %p941_p1 = scmp.ne.s32.totalorder %s1121_s10, %s940_s15  ;;  %s945_s17 = sshll.u32 %s998_s16, 4  ;;  %s946_s17 = int_to_ptr.vmem [resolvable:$false] %s945_s17 }
  0x39   : > { %s947_s18 = scalar_lea.vmem %s946_s17, 256  ;;  %p948_p10 = scmp.lt.s32.totalorder %s1121_s10, %s946_s17 }
  0x3a   : > { %p943_p4 = pnand %p941_p1, %p927_p11  ;;  %p949_p12 = scmp.lt.s32.totalorder %s947_s18, %s940_s15 }
  0x3c   : > { %p944_p5 = pneg %p943_p4  ;;  %p950_p0 = por %p949_p12, %p948_p10 }
  0x3e   : > { %p951_p2 = pnand %p950_p0, %p944_p5 }
  0x40   : > { %954 = shalt.err (!%p951_p2)
}
  0x41   : > { %853 = dma.hbm_to_vmem [thread:$0]  (!%p1123_p7), %s1119_s20, 128, %s1121_s10, %s246_s27  }
  0x42   : > { %p1321_p13 = scmp.ne.s32.totalorder %s1318_s30, 0 }
  0x43   : > { %s267_s19 = sand.u32 (!%p1321_p13), 1, %s985_s25   ;;  %p1322_p11 = scmp.ne.s32.totalorder (!%p1321_p13), %s1317_s29, 0 }
  0x44   : > { %265 = sbr.rel (%p1321_p13) target bundleno = 743 (0x2e7), region = 48  ;;  %s666_s9 = sshll.u32 (!%p1321_p13), %s267_s19, 3 }
  0x45   : > { %s268_s13 = scalar_lea.sflag (!%p1321_p13), [#allocation3], %s267_s19  ;;  %s271_s21 = scalar_lea.vmem (!%p1321_p13), [#allocation2], %s666_s9 }
  0x4b   : > { %972 = dma.done.wait (%p1322_p11), %s268_s13, 128  }
  0x4c   : > { %974 = vsyncadd (%p1322_p11), %s268_s13, 4294967168  ;;  %p1323_p3 = scmp.eq.s32.totalorder %s1061_s28, 0 }
  0x4e   : > { %976 = dma.done.wait (%p1323_p3), [#allocation5], 256   ;;  %p1324_p6 = pmov %p1323_p3 }
  0x4f   : > { %v999_v0 = vmov 0.0|0.0   ;;  %vm1000_vm0 = vmmov 0   ;;  %v1001_v1 = vmov 0.0   ;;  %v310_v2 = vld [vmem:[#allocation4] sm:$0xff]  ;;  %v311_v3 = vld [vmem:[#allocation4 + $0x8] sm:$0xff]  ;;  %v394_v5 = vld [vmem:[%s1309_s3] sm:$0xff] }
  0x50   : > { %978 = vsyncadd (%p1324_p6), [#allocation5], 4294967040  ;;  %789 = vmatprep.subr.bf16.mxu0 %v999_v0  ;;  %716 = vmatprep.mubr.msk.f32.mxu0 %vm1000_vm0, %v1001_v1  ;;  %v790_v4 = vpack.c.bf16 %v311_v3, %v310_v2  ;;  %v395_v6 = vld [vmem:[%s1309_s3 + $0x8] sm:$0xff]  ;;  %v396_v7 = vld [vmem:[%s1309_s3 + $0x10] sm:$0xff]  ;;  %vm319_vm1 = vcmask 130048   ;;  %p305_p7 = scmp.lt.s32.totalorder %s1061_s28, 1 }
  0x51   : > { %792 = vmatprep.subr.bf16.mxu1 %v999_v0  ;;  %751 = vmatprep.mubr.msk.f32.mxu1 %vm1000_vm0, %v1001_v1  ;;  %v793_v8 = vpack.c.bf16 %v395_v6, %v394_v5  ;;  %v397_v9 = vld [vmem:[%s1309_s3 + $0x18] sm:$0xff]  ;;  %v309_v10 = vld [vmem:[%s271_s21] sm:$0xff]  ;;  %v400_v15 = vld [vmem:[%s1309_s3 + $0x30] sm:$0xff]  ;;  %vm582_vm2 = vcmask 31744  }
  0x52   : > { %791 = vmatpush3.bf16.msra.mxu0 %v790_v4  ;;  %v796_v11 = vpack.c.bf16 %v397_v9, %v396_v7  ;;  %v398_v12 = vld [vmem:[%s1309_s3 + $0x20] sm:$0xff]  ;;  %v399_v13 = vld [vmem:[%s1309_s3 + $0x28] sm:$0xff]  ;;  %v401_v16 = vld [vmem:[%s1309_s3 + $0x38] sm:$0xff]  ;;  %s1330_s28 = smov (!%p305_p7, %s1061_s28), 1 }
  0x53   : > { %794 = vmatpush3.bf16.msra.mxu1 %v793_v8  ;;  %816 = vmatprep.subr.bf16.mxu0 %v999_v0  ;;  %v799_v14 = vpack.c.bf16 %v399_v13, %v398_v12  ;;  %v802_v17 = vpack.c.bf16 %v401_v16, %v400_v15  ;;  %v402_v18 = vld [vmem:[%s1309_s3 + $0x40] sm:$0xff]  ;;  %v403_v19 = vld [vmem:[%s1309_s3 + $0x48] sm:$0xff]  ;;  %v404_v21 = vld [vmem:[%s1309_s3 + $0x50] sm:$0xff]  ;;  %s668_s13 = sshll.u32 %s1330_s28, 3 }
  0x54   : > { %795 = vmatprep.subr.bf16.mxu1 %v999_v0  ;;  %v805_v20 = vpack.c.bf16 %v403_v19, %v402_v18  ;;  %v405_v22 = vld [vmem:[%s1309_s3 + $0x58] sm:$0xff]  ;;  %v406_v24 = vld [vmem:[%s1309_s3 + $0x60] sm:$0xff]  ;;  %v407_v25 = vld [vmem:[%s1309_s3 + $0x68] sm:$0xff]  ;;  %s308_s30 = scalar_lea.vmem %s1313_s7, %s668_s13 }
  0x55   : > { %717 = vmatmul.mubr.msk.f32.vlgmr.msra.gmra.mrb[0].mxu0 %vm319_vm1, %v309_v10  ;;  %v808_v23 = vpack.c.bf16 %v405_v22, %v404_v21  ;;  %v811_v26 = vpack.c.bf16 %v407_v25, %v406_v24  ;;  %v408_v27 = vld [vmem:[%s1309_s3 + $0x70] sm:$0xff]  ;;  %v409_v28 = vld [vmem:[%s1309_s3 + $0x78] sm:$0xff]  ;;  %v488_v30 = vld [vmem:[%s1311_s5] sm:$0xff] }
  0x56   : > { %786 = vmatprep.mubr.msk.f32.mxu0 %vm1000_vm0, %v1001_v1  ;;  %v814_v29 = vpack.c.bf16 %v409_v28, %v408_v27  ;;  %v489_v31 = vld [vmem:[%s1311_s5 + $0x8] sm:$0xff]  ;;  %v490_v32 = vld [vmem:[%s1311_s5 + $0x10] sm:$0xff]  ;;  %v491_v34 = vld [vmem:[%s1311_s5 + $0x18] sm:$0xff] }
  0x57   : > { %797 = vmatpush3.bf16.msra.mxu1 %v796_v11  ;;  %v817_v33 = vpack.c.bf16 %v489_v31, %v488_v30  ;;  %v820_v35 = vpack.c.bf16 %v491_v34, %v490_v32  ;;  %v492_v36 = vld [vmem:[%s1311_s5 + $0x20] sm:$0xff]  ;;  %v493_v37 = vld [vmem:[%s1311_s5 + $0x28] sm:$0xff]  ;;  %v494_v39 = vld [vmem:[%s1311_s5 + $0x30] sm:$0xff] }
  0x58   : > { %798 = vmatprep.subr.bf16.mxu1 %v999_v0  ;;  %v823_v38 = vpack.c.bf16 %v493_v37, %v492_v36  ;;  %v495_v40 = vld [vmem:[%s1311_s5 + $0x38] sm:$0xff]  ;;  %v496_v42 = vld [vmem:[%s1311_s5 + $0x40] sm:$0xff]  ;;  %v497_v43 = vld [vmem:[%s1311_s5 + $0x48] sm:$0xff] }
  0x59   : > { %818 = vmatpush3.bf16.msra.mxu0 %v817_v33  ;;  %v826_v41 = vpack.c.bf16 %v495_v40, %v494_v39  ;;  %v829_v44 = vpack.c.bf16 %v497_v43, %v496_v42  ;;  %v498_v45 = vld [vmem:[%s1311_s5 + $0x50] sm:$0xff]  ;;  %v499_v46 = vld [vmem:[%s1311_s5 + $0x58] sm:$0xff]  ;;  %v500_v48 = vld [vmem:[%s1311_s5 + $0x60] sm:$0xff] }
  0x5a   : > { %819 = vmatprep.subr.bf16.mxu0 %v999_v0  ;;  %v832_v47 = vpack.c.bf16 %v499_v46, %v498_v45  ;;  %v501_v49 = vld [vmem:[%s1311_s5 + $0x68] sm:$0xff]  ;;  %v669_v51 = vld [vmem:[%s1308_s2] ss:$0 sm:$0xff]  ;;  %v502_v56 = vld [vmem:[%s1311_s5 + $0x70] sm:$0xff] }
  0x5b   : > { %800 = vmatpush3.bf16.msra.mxu1 %v799_v14  ;;  %v835_v50 = vpack.c.bf16 %v501_v49, %v500_v48  ;;  %v503_v57 = vld [vmem:[%s1311_s5 + $0x78] sm:$0xff]  ;;  %v671_v59 = vld [vmem:[%s1310_s4] ss:$0 sm:$0xff] }
  0x5c   : > { %801 = vmatprep.subr.bf16.mxu1 %v999_v0  ;;  %v838_v58 = vpack.c.bf16 %v503_v57, %v502_v56 }
  0x5d   : > { %821 = vmatpush3.bf16.msra.mxu0 %v820_v35 }
  0x5e   : > { %822 = vmatprep.subr.bf16.mxu0 %v999_v0 }
  0x5f   : > { %803 = vmatpush3.bf16.msra.mxu1 %v802_v17 }
  0x60   : > { %804 = vmatprep.subr.bf16.mxu1 %v999_v0 }
  0x61   : > { %824 = vmatpush3.bf16.msra.mxu0 %v823_v38 }
  0x62   : > { %825 = vmatprep.subr.bf16.mxu0 %v999_v0 }
  0x63   : > { %806 = vmatpush3.bf16.msra.mxu1 %v805_v20 }
  0x64   : > { %807 = vmatprep.subr.bf16.mxu1 %v999_v0 }
  0x65   : > { %827 = vmatpush3.bf16.msra.mxu0 %v826_v41 }
  0x66   : > { %828 = vmatprep.subr.bf16.mxu0 %v999_v0 }
  0x67   : > { %809 = vmatpush3.bf16.msra.mxu1 %v808_v23 }
  0x68   : > { %810 = vmatprep.subr.bf16.mxu1 %v999_v0 }
  0x69   : > { %830 = vmatpush3.bf16.msra.mxu0 %v829_v44 }
  0x6a   : > { %831 = vmatprep.subr.bf16.mxu0 %v999_v0 }
  0x6b   : > { %812 = vmatpush3.bf16.msra.mxu1 %v811_v26 }
  0x6c   : > { %813 = vmatprep.subr.bf16.mxu1 %v999_v0 }
  0x6d   : > { %833 = vmatpush3.bf16.msra.mxu0 %v832_v47 }
  0x6e   : > { %834 = vmatprep.subr.bf16.mxu0 %v999_v0 }
  0x6f   : > { %815 = vmatpush3.bf16.msra.mxu1 %v814_v29 }
  0x71   : > { %836 = vmatpush3.bf16.msra.mxu0 %v835_v50 }
  0x72   : > { %837 = vmatprep.subr.bf16.mxu0 %v999_v0  ;;  %v672_v0 = vld [vmem:[%s1312_s6] ss:$0 sm:$0xff] }
  0x75   : > { %839 = vmatpush3.bf16.msra.mxu0 %v838_v58 }
 0x128   : > { %v389_v52 = vpop.f32.mrb[0].mxu0 }
 0x129   : > { %v390_v53 = vadd.f32 %v669_v51, %v389_v52  ;;  %v718_v54 = vpop.f32.mrb[1].mxu0 }
 0x12b   : > { %v393_v55 = vmax.f32 %v390_v53, 0.0 }
 0x12d   : > { %752 = vmatmul.mubr.f32.vlgmr.msra.gmra.mrb[0].mxu1 %v393_v55 }
 0x200   : > { %v483_v60 = vpop.f32.mrb[0].mxu1 }
 0x201   : > { %v484_v61 = vadd.f32 %v671_v59, %v483_v60  ;;  %v753_v62 = vpop.f32.mrb[1].mxu1 }
 0x203   : > { %v487_v63 = vmax.f32 %v484_v61, 0.0 }
 0x205   : > { %787 = vmatmul.mubr.f32.vlgmr.msra.gmra.mrb[2].mxu0 %v487_v63 }
 0x2d8   : > { %v577_v1 = vpop.f32.mrb[2].mxu0 }
 0x2d9   : > { %v578_v2 = vadd.f32 %v672_v0, %v577_v1  ;;  %v788_v3 = vpop.f32.mrb[3].mxu0 }
 0x2db   : > { %895 = vtanh.f32 %v578_v2 }
 0x2e5   : > { %v896_v4 = vpop.eup %895 }
 0x2e6   : > { %583 = vst.msk [vmem:[%s308_s30] sm:$0xff] %vm582_vm2, %v896_v4 }
 0x2e7 PF: > { %p18_p8 = scmp.ge.s32.totalorder %s1086_s11, 4   ;;  %s1325_s24 = smov %s985_s25 }
 0x2e8   : > { %s1326_s25 = smov %s989_s26  ;;  %s1327_s26 = smov %s1112_s14 }
 0x2e9   : > { %s1328_s27 = smov %s1086_s11  ;;  %20 = sbr.rel (!%p18_p8) target bundleno = 4 (0x4), region = 92 }
 0x2f0   :  { %603 = vsyncpa [#allocation3], 1 }
 0x2f1   :  { %605 = vsyncpa [#allocation3 + $0x1], 1 }
 0x2f2   :  { %606 = vsyncpa [#allocation5], 1 }

</bundles_post_ra>
